<compile_context>
chip_gen: v7x
topology: tpu7x:2x2x1
jax: 0.10.0
libtpu: 0.0.40
codegen_flags: <defaults>
</compile_context>

<pallas_src>
import functools

import jax
import jax.numpy as jnp
from jax.experimental import pallas as pl
from jax.experimental.pallas import tpu as pltpu

IGNORE_INDEX = 255


def _distance_kernel(table_ref, tblsq_ref, embs_ref, labels_ref, out_ref,
                     sum_acc, cnt_acc, iota_scr, *, loss_type, hw, tile_hw,
                     tiles_per_split):
    """One grid step processes a (C, tile_hw) channel-major tile of one image.

    Grid = (n_split, B, tiles_per_split).  The last axis is the sequential
    reduction ("arbitrary"); the leading split axis and the batch axis are
    "parallel" so both v7x TensorCores get work even when B == 1.
    """
    j = pl.program_id(2)

    # ---- init per-(split, image) partial accumulators + hoisted iota -------
    @pl.when(j == 0)
    def _():
        sum_acc[...] = jnp.zeros_like(sum_acc)
        cnt_acc[...] = jnp.zeros_like(cnt_acc)
        iota_scr[...] = jax.lax.broadcasted_iota(jnp.int32, iota_scr.shape, 0)

    labels = labels_ref[0]                                    # (1, T) int32
    # Positional mask handles both the ragged H*W tail and fully-OOB tiles of
    # the split-padded grid (index_map clamps the DMA; mask uses the unclamped
    # position so duplicated tiles contribute nothing).
    global_tile = pl.program_id(0) * tiles_per_split + j
    pos = global_tile * tile_hw + jax.lax.broadcasted_iota(
        jnp.int32, labels.shape, 1)
    valid = (labels != IGNORE_INDEX) & (pos < hw)             # (1, T)

    # Samples on the lane axis, channels on sublanes: every vreg fully dense.
    x = embs_ref[0].astype(jnp.float32)                       # (C, T)

    # Embedding lookup idx_to_vec[labels] as table^T @ one-hot on the MXU.
    onehot = (labels == iota_scr[...]).astype(jnp.float32)    # (K, T)
    gt = jnp.dot(table_ref[...], onehot,
                 preferred_element_type=jnp.float32)          # (C, T)

    if loss_type == 'L1':
        d = jnp.sum(jnp.abs(x - gt), axis=0, keepdims=True)           # (1, T)
    elif loss_type == 'L2':
        diff = x - gt
        d = jnp.sqrt(jnp.sum(diff * diff, axis=0, keepdims=True))
    elif loss_type == 'Linf':
        d = jnp.max(jnp.abs(x - gt), axis=0, keepdims=True)
    else:  # 'cosine' -> CosineEmbeddingLoss with target = +1: 1 - cos_sim
        num = jnp.sum(x * gt, axis=0, keepdims=True)
        xx = jnp.sum(x * x, axis=0, keepdims=True)
        # gg = ||table[label]||^2 via tiny (1,K)@(K,T) matmul (MXU has slack).
        gg = jnp.dot(tblsq_ref[...], onehot,
                     preferred_element_type=jnp.float32)       # (1, T)
        inv_den = jax.lax.rsqrt(jnp.maximum(xx * gg, 1e-16))   # EUP slot
        d = 1.0 - num * inv_den

    # Mask only the per-sample result (select kills NaN/Inf from garbage lanes).
    sum_acc[...] += jnp.where(valid, d, 0.0)
    cnt_acc[...] += valid.astype(jnp.float32)

    # ---- epilogue: emit (sum, count) for this (split, image) row ------------
    @pl.when(j == pl.num_programs(2) - 1)
    def _():
        tot = jnp.sum(sum_acc[...])
        cnt = jnp.sum(cnt_acc[...])
        lane = jax.lax.broadcasted_iota(jnp.int32, out_ref.shape, 3)
        out_ref[...] = jnp.where(lane == 0, tot,
                                 jnp.where(lane == 1, cnt, 0.0))


def _pick_tile(hw, requested, c, k, emb_itemsize, budget_bytes=24 << 20):
    """Largest legal lane tile (multiple of 128 or full hw) under a VMEM budget.

    Budget estimate per lane (bytes): double-buffered embs + labels inputs,
    f32 x / gt / diff temporaries, one-hot temp + iota scratch, accumulators.
    Parameterized on C so a larger embedding dim shrinks the tile (v7x 64 MiB).
    """
    if hw <= 128:
        return hw
    k_pad = ((k + 7) // 8) * 8
    per_lane = (2 * c * emb_itemsize      # double-buffered embs input
                + 2 * 4                   # double-buffered labels (int32)
                + 3 * c * 4               # x, gt, diff f32 temporaries
                + 2 * k_pad * 4           # one-hot temp + iota scratch
                + 2 * 4)                  # sum/cnt accumulators
    cap = min(hw, requested, max(128, budget_bytes // per_lane))
    return max(128, (cap // 128) * 128)


def distance_loss(embs_nchw, labels, idx_to_vec, *, loss_type='L2',
                  tile_hw=16384, hw_splits=2, vmem_limit_bytes=32 << 20):
    """Pallas wrapper reproducing DistanceLoss.forward (class_weight=None)."""
    B, C, H, W = embs_nchw.shape
    HW = H * W
    K, Cd = idx_to_vec.shape
    assert Cd == C, "idx_to_vec embedding dim must match channel dim"

    # Free, contiguous reshapes only: no NCHW->NHWC transpose, no padding copy.
    # embs may be bf16; the kernel upcasts to f32 after the (cheaper) HBM read.
    embs = embs_nchw.reshape(B, C, HW)
    lab = labels.reshape(B, 1, HW).astype(jnp.int32)
    table_f32 = idx_to_vec.astype(jnp.float32)
    table_t = jnp.transpose(table_f32)                          # (C, K), tiny
    tbl_sq = jnp.sum(table_f32 * table_f32, axis=-1).reshape(1, K)   # (1, K)

    t = _pick_tile(HW, tile_hw, C, K, jnp.dtype(embs.dtype).itemsize)
    n_hw = pl.cdiv(HW, t)
    n_split = max(1, min(hw_splits, n_hw))
    tiles_per_split = pl.cdiv(n_hw, n_split)

    def _hw_index(c, b, j):
        # Clamp so the DMA never targets a fully out-of-range block; the
        # in-kernel positional mask (unclamped) zeroes duplicated tiles.
        return (b, 0, jnp.minimum(c * tiles_per_split + j, n_hw - 1))

    kernel = functools.partial(
        _distance_kernel, loss_type=loss_type, hw=HW, tile_hw=t,
        tiles_per_split=tiles_per_split)

    out = pl.pallas_call(
        kernel,
        out_shape=jax.ShapeDtypeStruct((n_split, B, 1, 128), jnp.float32),
        grid_spec=pltpu.PrefetchScalarGridSpec(
            num_scalar_prefetch=0,
            grid=(n_split, B, tiles_per_split),
            in_specs=[
                pl.BlockSpec((C, K), lambda c, b, j: (0, 0)),   # table^T resident
                pl.BlockSpec((1, K), lambda c, b, j: (0, 0)),   # per-class |v|^2
                pl.BlockSpec((1, C, t), _hw_index),             # embs tile
                pl.BlockSpec((1, 1, t), _hw_index),             # labels tile
            ],
            out_specs=pl.BlockSpec((1, 1, 1, 128), lambda c, b, j: (c, b, 0, 0)),
            scratch_shapes=[pltpu.VMEM((1, t), jnp.float32),    # per-lane sum
                            pltpu.VMEM((1, t), jnp.float32),    # per-lane count
                            pltpu.VMEM((K, t), jnp.int32)],     # hoisted iota
        ),
        compiler_params=pltpu.CompilerParams(
            dimension_semantics=("parallel", "parallel", "arbitrary"),
            vmem_limit_bytes=vmem_limit_bytes),
    )(table_t, tbl_sq, embs, lab)

    total = jnp.sum(out[:, :, 0, 0])
    count = jnp.sum(out[:, :, 0, 1])
    return total / jnp.maximum(count, 1.0)


def _reference_loss(embs_nchw, labels, idx_to_vec, loss_type):
    """Pure-JAX reference mirroring the PyTorch forward, for sanity checking."""
    B, C, H, W = embs_nchw.shape
    x = jnp.transpose(embs_nchw, (0, 2, 3, 1)).reshape(-1, C).astype(jnp.float32)
    lab = labels.reshape(-1).astype(jnp.int32)
    valid = lab != IGNORE_INDEX
    safe = jnp.where(valid, lab, 0)
    gt = idx_to_vec[safe].astype(jnp.float32)
    if loss_type == 'L1':
        d = jnp.sum(jnp.abs(x - gt), axis=-1)
    elif loss_type == 'L2':
        d = jnp.sqrt(jnp.sum((x - gt) ** 2, axis=-1))
    elif loss_type == 'Linf':
        d = jnp.max(jnp.abs(x - gt), axis=-1)
    else:
        num = jnp.sum(x * gt, axis=-1)
        den = jnp.linalg.norm(x, axis=-1) * jnp.linalg.norm(gt, axis=-1)
        d = 1.0 - num / jnp.maximum(den, 1e-8)
    vf = valid.astype(jnp.float32)
    return jnp.sum(d * vf) / jnp.maximum(jnp.sum(vf), 1.0)


if __name__ == "__main__":
    key = jax.random.PRNGKey(0)
    k_emb, k_lab, k_vec = jax.random.split(key, 3)

    B, C, H, W = 2, 32, 16, 16
    NUM_CLASSES = 19

    # Deterministic synthetic "parameters" / inputs (no file loads).
    # idx_to_vec plays the role of the np.load'ed class-embedding table.
    idx_to_vec = jax.random.normal(k_vec, (NUM_CLASSES, C), dtype=jnp.float32)
    idx_to_vec = idx_to_vec / jnp.linalg.norm(idx_to_vec, axis=-1, keepdims=True)

    embs = jax.random.normal(k_emb, (B, C, H, W), dtype=jnp.float32)
    labels = jax.random.randint(k_lab, (B, H, W), 0, NUM_CLASSES, dtype=jnp.int32)
    # sprinkle some ignore_index pixels
    ignore_mask = jax.random.bernoulli(k_lab, p=0.1, shape=(B, H, W))
    labels = jnp.where(ignore_mask, IGNORE_INDEX, labels)

    ok = True
    for loss_type in ('L1', 'L2', 'Linf', 'cosine'):
        ref = _reference_loss(embs, labels, idx_to_vec, loss_type)

        # Default (large-tile) path.
        out = distance_loss(embs, labels, idx_to_vec, loss_type=loss_type)
        out = jax.block_until_ready(out)
        if not jnp.allclose(out, ref, rtol=1e-4, atol=1e-4):
            ok = False
            print(f"MISMATCH {loss_type} (default tile): kernel={out} ref={ref}")

        # Small-tile, HW-split path (exercises the leading parallel grid axis).
        out2 = distance_loss(embs, labels, idx_to_vec, loss_type=loss_type,
                             tile_hw=128, hw_splits=2)
        out2 = jax.block_until_ready(out2)
        if not jnp.allclose(out2, ref, rtol=1e-4, atol=1e-4):
            ok = False
            print(f"MISMATCH {loss_type} (split path): kernel={out2} ref={ref}")

        # bf16 activations path (halved HBM traffic); reference fed the same
        # bf16-rounded values so the results should agree closely.
        embs_bf16 = embs.astype(jnp.bfloat16)
        out3 = distance_loss(embs_bf16, labels, idx_to_vec, loss_type=loss_type)
        out3 = jax.block_until_ready(out3)
        ref3 = _reference_loss(embs_bf16, labels, idx_to_vec, loss_type)
        if not jnp.allclose(out3, ref3, rtol=1e-3, atol=1e-3):
            ok = False
            print(f"MISMATCH {loss_type} (bf16): kernel={out3} ref={ref3}")

    if ok:
        print("KERNEL_OK")
</pallas_src>

<mosaic_0001>
module attributes {stable_mosaic.version = 11 : i64} {
  func.func @_distance_kernel(%arg0: i32, %arg1: i32, %arg2: i32, %arg3: memref<32x19xf32, #tpu.memory_space<vmem>>, %arg4: memref<1x19xf32, #tpu.memory_space<vmem>>, %arg5: memref<1x32x256xf32, #tpu.memory_space<vmem>>, %arg6: memref<1x1x256xi32, #tpu.memory_space<vmem>>, %arg7: memref<1x1x1x128xf32, #tpu.memory_space<vmem>>, %arg8: memref<1x256xf32, #tpu.memory_space<vmem>>, %arg9: memref<1x256xf32, #tpu.memory_space<vmem>>, %arg10: memref<19x256xi32, #tpu.memory_space<vmem>>) attributes {dimension_semantics = [#tpu.dimension_semantics<parallel>, #tpu.dimension_semantics<parallel>, #tpu.dimension_semantics<arbitrary>], iteration_bounds = array<i64: 1, 2, 1>, scalar_prefetch = 0 : i64, scratch_operands = 3 : i64, tpu.core_type = #tpu.core_type<tc>, window_params = [{pipeline_mode = #tpu.pipeline_mode<synchronous>, transform_indices = @transform_0, window_bounds = array<i64: 32, 19>}, {pipeline_mode = #tpu.pipeline_mode<synchronous>, transform_indices = @transform_1, window_bounds = array<i64: 1, 19>}, {transform_indices = @transform_2, window_bounds = array<i64: 1, 32, 256>}, {transform_indices = @transform_3, window_bounds = array<i64: 1, 1, 256>}, {transform_indices = @transform_4, window_bounds = array<i64: 1, 1, 1, 128>}]} {
    %c0_i32 = arith.constant 0 : i32
    %0 = arith.cmpi eq, %arg2, %c0_i32 : i32
    %1 = arith.extui %0 : i1 to i32
    %c0_i32_0 = arith.constant 0 : i32
    %2 = arith.cmpi ne, %1, %c0_i32_0 : i32
    scf.if %2 {
      %cst_23 = arith.constant 0.000000e+00 : f32
      %42 = vector.broadcast %cst_23 : f32 to vector<1x256xf32>
      %c0_24 = arith.constant 0 : index
      %c0_25 = arith.constant 0 : index
      %43 = vector.load %arg8[%c0_24, %c0_25] : memref<1x256xf32, #tpu.memory_space<vmem>>, vector<1x256xf32>
      tpu.vector_store %arg8[%c0_24, %c0_25], %42 {strides = array<i32>} : memref<1x256xf32, #tpu.memory_space<vmem>>, vector<1x256xf32>,
      %cst_26 = arith.constant 0.000000e+00 : f32
      %44 = vector.broadcast %cst_26 : f32 to vector<1x256xf32>
      %c0_27 = arith.constant 0 : index
      %c0_28 = arith.constant 0 : index
      %45 = vector.load %arg9[%c0_27, %c0_28] : memref<1x256xf32, #tpu.memory_space<vmem>>, vector<1x256xf32>
      tpu.vector_store %arg9[%c0_27, %c0_28], %44 {strides = array<i32>} : memref<1x256xf32, #tpu.memory_space<vmem>>, vector<1x256xf32>,
      %46 = tpu.iota {dimensions = array<i32: 0>} : vector<19x256xi32>
      %c0_29 = arith.constant 0 : index
      %c0_30 = arith.constant 0 : index
      %47 = vector.load %arg10[%c0_29, %c0_30] : memref<19x256xi32, #tpu.memory_space<vmem>>, vector<19x256xi32>
      tpu.vector_store %arg10[%c0_29, %c0_30], %46 {strides = array<i32>} : memref<19x256xi32, #tpu.memory_space<vmem>>, vector<19x256xi32>,
    } else {
    }
    %c0 = arith.constant 0 : index
    %c0_1 = arith.constant 0 : index
    %c0_2 = arith.constant 0 : index
    %3 = vector.load %arg6[%c0, %c0_1, %c0_2] : memref<1x1x256xi32, #tpu.memory_space<vmem>>, vector<1x1x256xi32>
    %4 = vector.shape_cast %3 : vector<1x1x256xi32> to vector<1x256xi32>
    %c1_i32 = arith.constant 1 : i32
    %5 = arith.muli %arg0, %c1_i32 : i32
    %6 = arith.addi %5, %arg2 : i32
    %c256_i32 = arith.constant 256 : i32
    %7 = arith.muli %6, %c256_i32 : i32
    %8 = tpu.iota {dimensions = array<i32: 1>} : vector<1x256xi32>
    %9 = vector.broadcast %7 : i32 to vector<1x256xi32>
    %10 = arith.addi %9, %8 : vector<1x256xi32>
    %c255_i32 = arith.constant 255 : i32
    %11 = vector.broadcast %c255_i32 : i32 to vector<1x256xi32>
    %12 = arith.cmpi ne, %4, %11 : vector<1x256xi32>
    %c256_i32_3 = arith.constant 256 : i32
    %13 = vector.broadcast %c256_i32_3 : i32 to vector<1x256xi32>
    %14 = arith.cmpi slt, %10, %13 : vector<1x256xi32>
    %15 = arith.andi %12, %14 : vector<1x256xi1>
    %c0_4 = arith.constant 0 : index
    %c0_5 = arith.constant 0 : index
    %c0_6 = arith.constant 0 : index
    %16 = vector.load %arg5[%c0_4, %c0_5, %c0_6] : memref<1x32x256xf32, #tpu.memory_space<vmem>>, vector<1x32x256xf32>
    %17 = vector.shape_cast %16 : vector<1x32x256xf32> to vector<32x256xf32>
    %c0_7 = arith.constant 0 : index
    %c0_8 = arith.constant 0 : index
    %18 = vector.load %arg10[%c0_7, %c0_8] : memref<19x256xi32, #tpu.memory_space<vmem>>, vector<19x256xi32>
    %19 = vector.broadcast %4 : vector<1x256xi32> to vector<19x256xi32>
    %20 = arith.cmpi eq, %19, %18 : vector<19x256xi32>
    %21 = arith.extui %20 : vector<19x256xi1> to vector<19x256xi32>
    %22 = arith.sitofp %21 : vector<19x256xi32> to vector<19x256xf32>
    %c0_9 = arith.constant 0 : index
    %c0_10 = arith.constant 0 : index
    %23 = vector.load %arg3[%c0_9, %c0_10] : memref<32x19xf32, #tpu.memory_space<vmem>>, vector<32x19xf32>
    %cst = arith.constant dense<0.000000e+00> : vector<32x256xf32>
    %24 = tpu.matmul %23, %22, %cst {dimension_numbers = #tpu.dot_dimension_numbers<[1], [0], [0], [1], [0, 0, 1, 1], [], []>} : vector<32x19xf32>, vector<19x256xf32>, vector<32x256xf32> -> vector<32x256xf32>
    %25 = arith.subf %17, %24 : vector<32x256xf32>
    %26 = math.absf %25 : vector<32x256xf32>
    %cst_11 = arith.constant dense<0.000000e+00> : vector<256xf32>
    %27 = vector.multi_reduction <add>, %26, %cst_11 [0] : vector<32x256xf32> to vector<256xf32>
    %28 = vector.shape_cast %27 : vector<256xf32> to vector<1x256xf32>
    %c0_12 = arith.constant 0 : index
    %c0_13 = arith.constant 0 : index
    %29 = vector.load %arg8[%c0_12, %c0_13] : memref<1x256xf32, #tpu.memory_space<vmem>>, vector<1x256xf32>
    %cst_14 = arith.constant 0.000000e+00 : f32
    %30 = vector.broadcast %cst_14 : f32 to vector<1x256xf32>
    %31 = arith.select %15, %28, %30 : vector<1x256xi1>, vector<1x256xf32>
    %32 = arith.addf %29, %31 : vector<1x256xf32>
    %c0_15 = arith.constant 0 : index
    %c0_16 = arith.constant 0 : index
    %33 = vector.load %arg8[%c0_15, %c0_16] : memref<1x256xf32, #tpu.memory_space<vmem>>, vector<1x256xf32>
    tpu.vector_store %arg8[%c0_15, %c0_16], %32 {strides = array<i32>} : memref<1x256xf32, #tpu.memory_space<vmem>>, vector<1x256xf32>,
    %c0_17 = arith.constant 0 : index
    %c0_18 = arith.constant 0 : index
    %34 = vector.load %arg9[%c0_17, %c0_18] : memref<1x256xf32, #tpu.memory_space<vmem>>, vector<1x256xf32>
    %35 = arith.extui %15 : vector<1x256xi1> to vector<1x256xi32>
    %36 = arith.sitofp %35 : vector<1x256xi32> to vector<1x256xf32>
    %37 = arith.addf %34, %36 : vector<1x256xf32>
    %c0_19 = arith.constant 0 : index
    %c0_20 = arith.constant 0 : index
    %38 = vector.load %arg9[%c0_19, %c0_20] : memref<1x256xf32, #tpu.memory_space<vmem>>, vector<1x256xf32>
    tpu.vector_store %arg9[%c0_19, %c0_20], %37 {strides = array<i32>} : memref<1x256xf32, #tpu.memory_space<vmem>>, vector<1x256xf32>,
    %c0_i32_21 = arith.constant 0 : i32
    %39 = arith.cmpi eq, %arg2, %c0_i32_21 : i32
    %40 = arith.extui %39 : i1 to i32
    %c0_i32_22 = arith.constant 0 : i32
    %41 = arith.cmpi ne, %40, %c0_i32_22 : i32
    scf.if %41 {
      %c0_23 = arith.constant 0 : index
      %c0_24 = arith.constant 0 : index
      %42 = vector.load %arg8[%c0_23, %c0_24] : memref<1x256xf32, #tpu.memory_space<vmem>>, vector<1x256xf32>
      %43 = vector.shape_cast %42 : vector<1x256xf32> to vector<1x1x256xf32>
      %cst_25 = arith.constant dense<0.000000e+00> : vector<1xf32>
      %44 = vector.multi_reduction <add>, %43, %cst_25 [1, 2] : vector<1x1x256xf32> to vector<1xf32>
      %45 = vector.shape_cast %44 : vector<1xf32> to vector<1x1x1xf32>
      %46 = vector.extract %45[0, 0, 0] : f32 from vector<1x1x1xf32>
      %c0_26 = arith.constant 0 : index
      %c0_27 = arith.constant 0 : index
      %47 = vector.load %arg9[%c0_26, %c0_27] : memref<1x256xf32, #tpu.memory_space<vmem>>, vector<1x256xf32>
      %48 = vector.shape_cast %47 : vector<1x256xf32> to vector<1x1x256xf32>
      %cst_28 = arith.constant dense<0.000000e+00> : vector<1xf32>
      %49 = vector.multi_reduction <add>, %48, %cst_28 [1, 2] : vector<1x1x256xf32> to vector<1xf32>
      %50 = vector.shape_cast %49 : vector<1xf32> to vector<1x1x1xf32>
      %51 = vector.extract %50[0, 0, 0] : f32 from vector<1x1x1xf32>
      %52 = tpu.iota {dimensions = array<i32: 3>} : vector<1x1x1x128xi32>
      %c0_i32_29 = arith.constant 0 : i32
      %53 = vector.broadcast %c0_i32_29 : i32 to vector<1x1x1x128xi32>
      %54 = arith.cmpi eq, %52, %53 : vector<1x1x1x128xi32>
      %c1_i32_30 = arith.constant 1 : i32
      %55 = vector.broadcast %c1_i32_30 : i32 to vector<1x1x1x128xi32>
      %56 = arith.cmpi eq, %52, %55 : vector<1x1x1x128xi32>
      %cst_31 = arith.constant 0.000000e+00 : f32
      %57 = vector.broadcast %51 : f32 to vector<1x1x1x128xf32>
      %58 = vector.broadcast %cst_31 : f32 to vector<1x1x1x128xf32>
      %59 = arith.select %56, %57, %58 : vector<1x1x1x128xi1>, vector<1x1x1x128xf32>
      %60 = vector.broadcast %46 : f32 to vector<1x1x1x128xf32>
      %61 = arith.select %54, %60, %59 : vector<1x1x1x128xi1>, vector<1x1x1x128xf32>
      %c0_32 = arith.constant 0 : index
      %c0_33 = arith.constant 0 : index
      %c0_34 = arith.constant 0 : index
      %c0_35 = arith.constant 0 : index
      %62 = vector.load %arg7[%c0_32, %c0_33, %c0_34, %c0_35] : memref<1x1x1x128xf32, #tpu.memory_space<vmem>>, vector<1x1x1x128xf32>
      tpu.vector_store %arg7[%c0_32, %c0_33, %c0_34, %c0_35], %61 {strides = array<i32>} : memref<1x1x1x128xf32, #tpu.memory_space<vmem>>, vector<1x1x1x128xf32>,
    } else {
    }
    return
  }
  func.func @transform_0(%arg0: i32, %arg1: i32, %arg2: i32) -> (i32, i32) {
    %c0_i32 = arith.constant 0 : i32
    %c0_i32_0 = arith.constant 0 : i32
    %c0_i32_1 = arith.constant 0 : i32
    return %c0_i32, %c0_i32_0 : i32, i32
  }
  func.func @transform_1(%arg0: i32, %arg1: i32, %arg2: i32) -> (i32, i32) {
    %c0_i32 = arith.constant 0 : i32
    %c0_i32_0 = arith.constant 0 : i32
    %c0_i32_1 = arith.constant 0 : i32
    return %c0_i32, %c0_i32_0 : i32, i32
  }
  func.func @transform_2(%arg0: i32, %arg1: i32, %arg2: i32) -> (i32, i32, i32) {
    %c1_i32 = arith.constant 1 : i32
    %0 = arith.muli %arg0, %c1_i32 : i32
    %1 = arith.addi %0, %arg2 : i32
    %c0_i32 = arith.constant 0 : i32
    %2 = arith.minsi %1, %c0_i32 : i32
    %c0_i32_0 = arith.constant 0 : i32
    %c0_i32_1 = arith.constant 0 : i32
    return %arg1, %c0_i32_0, %2 : i32, i32, i32
  }
  func.func @transform_3(%arg0: i32, %arg1: i32, %arg2: i32) -> (i32, i32, i32) {
    %c1_i32 = arith.constant 1 : i32
    %0 = arith.muli %arg0, %c1_i32 : i32
    %1 = arith.addi %0, %arg2 : i32
    %c0_i32 = arith.constant 0 : i32
    %2 = arith.minsi %1, %c0_i32 : i32
    %c0_i32_0 = arith.constant 0 : i32
    %c0_i32_1 = arith.constant 0 : i32
    return %arg1, %c0_i32_0, %2 : i32, i32, i32
  }
  func.func @transform_4(%arg0: i32, %arg1: i32, %arg2: i32) -> (i32, i32, i32, i32) {
    %c0_i32 = arith.constant 0 : i32
    %c0_i32_0 = arith.constant 0 : i32
    %c0_i32_1 = arith.constant 0 : i32
    return %arg0, %arg1, %c0_i32, %c0_i32_0 : i32, i32, i32, i32
  }
}

</mosaic_0001>

<bundles_post_ra>
// kernel: tpu_custom_call.1
= control target key start
LH: loop header
LB: loop body
LE: loop exit
PB: predicated region body
PF: predicated region fallthrough
CT: control target
= control target key end

     0   :  { %9 = vsyncpa [#allocation6], 0  ;;  %s1249_s0 = inlined_call_operand.vmem [shape: f32[32,19], index: 0, kind: input, shape index: {}]   ;;  %s1250_s1 = inlined_call_operand.vmem [shape: f32[1,19], index: 1, kind: input, shape index: {}]   ;;  %s1251_s2 = inlined_call_operand.hbm [shape: f32[2,32,256], index: 2, kind: input, shape index: {}]   ;;  %s1252_s3 = inlined_call_operand.vmem [shape: s32[2,1,256], index: 3, kind: input, shape index: {}]   ;;  %s1253_s4 = inlined_call_operand.hbm [shape: f32[1,2,1,128], index: 4, kind: output, shape index: {}]  }
   0x1   :  { %11 = vsyncpa [#allocation6 + $0x1], 0 }
   0x2   :  { %12 = vsyncpa [#allocation7], 0 }
   0x3   :  { %14 = vsyncpa [#allocation7 + $0x1], 0  ;;  %s1005_s15 = smov 0   ;;  %s1007_s16 = smov 0  }
   0x4   :  { %s1009_s17 = smov 0   ;;  %s1011_s1 = smov 0  }
   0x5   :  { %s1013_s18 = smov 0   ;;  %s1015_s19 = smov 0  }
   0x6 LB: > { %s747_s20 = sadd.s32 4294967295, %s970_s19   ;;  %s748_s21 = sadd.s32 4294967294, %s970_s19   ;;  %s970_s19 = sphi %s1015_s19, %s20_s19   ;;  %s966_s18 = sphi %s1013_s18, %s1272_s18   ;;  %s962_s1 = sphi %s1011_s1, %s1271_s1   ;;  %s958_s17 = sphi %s1009_s17, %s1270_s17   ;;  %s954_s16 = sphi %s1007_s16, %s1269_s16   ;;  %s950_s15 = sphi %s1005_s15, %s1268_s15  }
   0x7   : > { %s35_s22 = sadd.s32 1, %s966_s18  ;;  %s96_s23 = sadd.s32 1, %s958_s17 }
   0x8   : > { %p37_p0 = scmp.ge.s32.totalorder %s35_s22, 2  ;;  %p103_p1 = scmp.ne.s32.totalorder %s958_s17, %s954_s16 }
   0x9   : > { %p104_p2 = scmp.eq.s32.totalorder %s970_s19, 0  ;;  %p109_p3 = scmp.ne.s32.totalorder %s954_s16, %s950_s15 }
   0xa   : > { %s1274_s22 = smov (%p37_p0, %s35_s22), 0  ;;  %p110_p5 = scmp.eq.s32.totalorder %s747_s20, 0 }
   0xb   : > { %p1046_p4 = por %p104_p2, %p103_p1  ;;  %s91_s25 = ssub.s32 %s966_s18, %s1274_s22 }
   0xc   : > { %p169_p6 = scmp.eq.s32.totalorder %s747_s20, 1  ;;  %p94_p7 = scmp.eq.s32.totalorder %s91_s25, 0 }
   0xd   : > { %p1052_p8 = por %p110_p5, %p109_p3  ;;  %p175_p10 = scmp.eq.s32.totalorder %s748_s21, 1 }
   0xe   : > { %p1056_p9 = por %p169_p6, %p103_p1  ;;  %p802_p13 = scmp.lt.s32.totalorder %s970_s19, 2 }
   0xf   : > { %s1061_s28 = scalar_select %p94_p7, %s958_s17, %s96_s23  }
  0x10   : > { %s1257_s27 = scalar_select %p1056_p9, 1, 0 }
  0x11   : > { %p1063_p11 = por %p175_p10, %p109_p3  ;;  %s201_s30 = sand.u32 1, %s958_s17  }
  0x12   : > { %s751_s5 = sshll.u32 %s201_s30, 6  ;;  %s777_s6 = sshll.u32 %s966_s18, 10 }
  0x13   : > { %s1258_s29 = scalar_select %p1063_p11, 1, 0 }
  0x14   : > { %s1074_s9 = scalar_lea.hbm %s1251_s2, %s777_s6  ;;  %s205_s10 = scalar_lea.vmem [#allocation5], %s751_s5 }
  0x15   : > { %s217_s11 = sshll.u32 %s205_s10, 4  ;;  %p1080_p0 = pnand %p802_p13, %p1046_p4  ;;  %s1076_s11 = int_to_ptr.vmem [resolvable:$true] %s217_s11 }
  0x16   : > { %s1085_s13 = scalar_lea.sflag [#allocation6], %s201_s30  ;;  %s858_s14 = scalar_lea.hbm %s1074_s9, 1024 }
  0x17   : > { %p859_p2 = scmp.ne.s32.totalorder %s1074_s9, %s858_s14  ;;  %p860_p3 = pneg %p1080_p0 }
  0x18   : > { %s863_s23 = scalar_lea.hbm %s1251_s2, 2048  ;;  %p864_p4 = scmp.lt.u32.totalorder %s1074_s9, %s1251_s2 }
  0x19   : > { %p861_p5 = pnand %p860_p3, %p859_p2  ;;  %p865_p7 = scmp.lt.u32.totalorder %s863_s23, %s858_s14 }
  0x1a   : > { %p867_p13 = scmp.lt.u32.totalorder %s858_s14, %s1074_s9 }
  0x1b   : > { %p862_p6 = pneg %p861_p5  ;;  %p866_p10 = por %p865_p7, %p864_p4 }
  0x1d   : > { %p868_p12 = por %p867_p13, %p866_p10 }
  0x1f   : > { %p869_p1 = pnand %p868_p12, %p862_p6 }
  0x21   : > { %872 = shalt.err (!%p869_p1)
}
  0x22   : > { %s873_s30 = scalar_lea.vmem %s1076_s11, 1024  ;;  %s972_s5 = smov [#allocation5]  }
  0x23   : > { %p874_p2 = scmp.ne.s32.totalorder %s1076_s11, %s873_s30  ;;  %s878_s6 = sshll.u32 %s972_s5, 4  ;;  %s879_s6 = int_to_ptr.vmem [resolvable:$false] %s878_s6 }
  0x24   : > { %s880_s7 = scalar_lea.vmem %s879_s6, 2048  ;;  %p881_p9 = scmp.lt.s32.totalorder %s1076_s11, %s879_s6 }
  0x25   : > { %p876_p5 = pnand %p874_p2, %p860_p3  ;;  %p882_p4 = scmp.lt.s32.totalorder %s880_s7, %s873_s30 }
  0x27   : > { %p877_p11 = pneg %p876_p5  ;;  %p883_p7 = por %p882_p4, %p881_p9 }
  0x29   : > { %p884_p10 = pnand %p883_p7, %p877_p11 }
  0x2b   : > { %887 = shalt.err (!%p884_p10)
}
  0x2c   : > { %s973_s8 = smov 256   ;;  %s974_s10 = smov 16  }
  0x2d   : > { %797 = dma.hbm_to_vmem [thread:$0]  (!%p1080_p0), %s1074_s9, 1024, %s1076_s11, %s1085_s13, %s973_s8, %s973_s8, %s974_s10  }
  0x2e   : > { %p243_p12 = scmp.lt.s32.totalorder %s970_s19, 3  ;;  %p1260_p1 = scmp.ge.s32.totalorder %s970_s19, 1 }
  0x30   : > { %p244_p3 = pnand %p1260_p1, %p243_p12 }
  0x31   : > { %s1117_s14 = sand.u32 (!%p244_p3), 1, %s954_s16  }
  0x32   : > { %247 = sbr.rel (%p244_p3) target bundleno = 562 (0x232), region = 36  ;;  %s755_s20 = sshll.u32 (!%p244_p3), %s1117_s14, 6 }
  0x33   : > { %s250_s21 = scalar_lea.sflag (!%p244_p3), [#allocation6], %s1117_s14  ;;  %s1121_s23 = scalar_lea.vmem (!%p244_p3), [#allocation5], %s755_s20 }
  0x39   : > { %941 = dma.done.wait (%p1052_p8), %s250_s21, 1024  }
  0x3a   : > { %943 = vsyncadd (%p1052_p8), %s250_s21, 4294966272  ;;  %p296_p9 = scmp.lt.s32.totalorder %s962_s1, 1  ;;  %v311_v0 = vlaneseq  ;;  %v975_v1 = vmov 1966171168   ;;  %v976_v3 = vmov 0.0   ;;  %v977_v6 = vmov 1  }
  0x3b   : > { %v343_v2 = vunpack.c.l.s4 %v975_v1  ;;  %486 = vmatprep.mubr.f32.mxu0 %v976_v3  ;;  %498 = vmatprep.mubr.f32.mxu1 %v976_v3  ;;  %v341_v7 = vcombine.low %v977_v6, %v977_v6  ;;  %v978_v21 = vmov 1.0|1.0   ;;  %vm415_vm10 = vcmask 1042432   ;;  %v398_v28 = vld [vmem:[%s1249_s0] sm:$0xff]  ;;  %v400_v29 = vld [vmem:[%s1249_s0 + $0x10] sm:$0xff]  ;;  %v399_v30 = vld [vmem:[%s1249_s0 + $0x8] sm:$0xff] }
  0x3c   : > { %s297_s9 = scalar_select %p296_p9, %s962_s1, 1  ;;  %vm1130_vm0 = vcmp.lt.s32.totalorder %v311_v0, 256  ;;  %v318_v5 = vshrl.u32 %v311_v0, 7  ;;  %vm402_vm13 = vcmask 154624   ;;  %v401_v31 = vld [vmem:[%s1249_s0 + $0x18] sm:$0xff]  ;;  %v360_v39 = vld [vmem:[%s1121_s23 + $0x10] sm:$0xff] }
  0x3d   : > { %315 = vst.msk [vmem:[#allocation2] sm:$0x3] %vm1130_vm0, %v976_v3  ;;  %316 = vst.msk [vmem:[#allocation3] sm:$0x3] %vm1130_vm0, %v976_v3  ;;  %v344_v8 = vunpack.c.0.s8 %v343_v2  ;;  %v358_v32 = vld [vmem:[%s1121_s23] sm:$0xff]  ;;  %v359_v35 = vld [vmem:[%s1121_s23 + $0x8] sm:$0xff] }
  0x3e   : > { %s756_s26 = sshll.u32 %s297_s9, 1  ;;  %v319_v9 = vadd.s32 8, %v318_v5  ;;  %v1139_v10 = vsub.s32 1, %v318_v5  ;;  %v1141_v11 = vsub.s32 0, %v318_v5  ;;  %v320_v12 = vadd.s32 16, %v318_v5  ;;  %v362_v38 = vld [vmem:[%s1121_s23 + $0x20] sm:$0xff] }
  0x3f   : > { %s302_s13 = scalar_lea.vmem %s1252_s3, %s756_s26  ;;  %v1146_v13 = vsub.s32 %v344_v8, %v318_v5  ;;  %v364_v40 = vld [vmem:[%s1121_s23 + $0x30] sm:$0xff]  ;;  %v363_v42 = vld [vmem:[%s1121_s23 + $0x28] sm:$0xff]  ;;  %v361_v43 = vld [vmem:[%s1121_s23 + $0x18] sm:$0xff]  ;;  %vm591_vm14 = vcmask 1040384   ;;  %s774_s20 = sshll.u32 %s962_s1, 4 }
  0x40   : > { %326 = vst [vmem:[#allocation4 + $0x28] sm:$0x7] %v320_v12  ;;  %325 = vst [vmem:[#allocation4 + $0x20] sm:$0x7] %v320_v12  ;;  %v327_v14 = vld [vmem:[%s302_s13] sm:$0x3]  ;;  %s1200_s13 = scalar_lea.hbm %s1253_s4, %s774_s20 }
  0x41   : > { %v348_v15 = vrot.slane %v341_v7, %v1146_v13  ;;  %v379_v16 = vrot.slane %v327_v14, %v1139_v10  ;;  %v375_v17 = vrot.slane %v327_v14, %v1141_v11  ;;  %vm336_vm1 = vcmp.ne.s32.totalorder %v327_v14, 255  ;;  %v365_v44 = vld [vmem:[%s1121_s23 + $0x38] sm:$0xff]  ;;  %s287_s23 = scalar_lea.vmem [#allocation8], %s1117_s14  ;;  %s636_s1 = scalar_lea.sflag [#allocation7], %s1117_s14 }
  0x42   : > { %s650_s9 = sshll.u32 %s287_s23, 4  ;;  %p1265_p11 = scmp.ne.s32.totalorder %s1257_s27, 0  ;;  %s1202_s9 = int_to_ptr.vmem [resolvable:$true] %s650_s9 }
  0x43   : > { %v355_v18 = vrot.slane %v348_v15, %v1146_v13  ;;  %vm381_vm2 = vcmp.eq.s32.totalorder %v379_v16, %v318_v5  ;;  %vm383_vm3 = vcmp.eq.s32.totalorder %v379_v16, %v319_v9  ;;  %vm380_vm4 = vcmp.eq.s32.totalorder %v375_v17, %v318_v5  ;;  %s888_s24 = scalar_lea.vmem %s1202_s9, 16  ;;  %s979_s25 = smov [#allocation8]  }
  0x44   : > { %vm382_vm5 = vcmp.eq.s32.totalorder %v375_v17, %v319_v9  ;;  %vm778_vm7 = vmpackc.low %vm383_vm3, %vm381_vm2  ;;  %v571_v19 = vld [vmem:[#allocation3] sm:$0x3]  ;;  %p889_p8 = scmp.ne.s32.totalorder %s1202_s9, %s888_s24  ;;  %s892_s30 = sshll.u32 %s979_s25, 4  ;;  %s893_s30 = int_to_ptr.vmem [resolvable:$false] %s892_s30 }
  0x45   : > { %vm356_vm6 = vcmp.ne.s32.totalorder %v355_v18, 0  ;;  %779 = vmatprep.subr.msk.bf16.mxu0 %vm778_vm7, %v978_v21  ;;  %782 = vmatprep.subr.msk.bf16.mxu1 %vm778_vm7, %v978_v21  ;;  %vm780_vm9 = vmpackc.low %vm382_vm5, %vm380_vm4  ;;  %s894_s5 = scalar_lea.vmem %s893_s30, 32  ;;  %p895_p13 = scmp.lt.s32.totalorder %s1202_s9, %s893_s30 }
  0x46   : > { %vm1152_vm8 = vmand %vm336_vm1, %vm356_vm6  ;;  %781 = vmatpush1.bf16.msk.msra.mxu0 %vm780_vm9, %v978_v21  ;;  %784 = vmatpush1.bf16.msk.msra.mxu1 %vm780_vm9, %v978_v21  ;;  %p890_p0 = pnand %p889_p8, %p1265_p11  ;;  %p896_p2 = scmp.lt.s32.totalorder %s894_s5, %s888_s24 }
  0x47   : > { %v773_v22 = vsel %vm1152_vm8, 1.0, %v976_v3  ;;  %v371_v23 = vld [vmem:[#allocation4 + $0x28] sm:$0x7]  ;;  %v370_v24 = vld [vmem:[#allocation4 + $0x20] sm:$0x7] }
  0x48   : > { %v574_v25 = vadd.f32 %v773_v22, %v571_v19  ;;  %vm385_vm11 = vcmp.eq.s32.totalorder %v379_v16, %v371_v23  ;;  %vm384_vm12 = vcmp.eq.s32.totalorder %v375_v17, %v370_v24  ;;  %p891_p6 = pneg %p890_p0  ;;  %p897_p5 = por %p896_p2, %p895_p13 }
  0x49   : > { %v762_v26 = vsel %vm385_vm11, 1.0, %v976_v3  ;;  %v761_v27 = vsel %vm384_vm12, 1.0, %v976_v3 }
  0x4a   : > { %575 = vst.msk [vmem:[#allocation3] sm:$0x3] %vm1130_vm0, %v574_v25  ;;  %767 = vmatprep.subr.msk.mxu0 %vm415_vm10, %v762_v26  ;;  %783 = vmatprep.subr.msk.mxu1 %vm415_vm10, %v762_v26  ;;  %v545_v26 = vld [vmem:[#allocation2] sm:$0x3]  ;;  %p898_p4 = pnand %p897_p5, %p891_p6 }
  0x4b   : > { %768 = vmatpush1.msk.msra.mxu0 %vm415_vm10, %v761_v27  ;;  %785 = vmatpush1.msk.msra.mxu1 %vm415_vm10, %v761_v27 }
  0x4c   : > { %769 = vmatmul.mubr.msk.f32.vlgmr.msra.gmra.mrb[0].mxu0 %vm402_vm13, %v398_v28  ;;  %771 = vmatmul.mubr.msk.f32.vlgmr.msra.gmra.mrb[0].mxu1 %vm402_vm13, %v400_v29 }
  0x4d   : > { %492 = vmatprep.mubr.f32.mxu0 %v976_v3  ;;  %504 = vmatprep.mubr.f32.mxu1 %v976_v3 }
  0x50   : > { %770 = vmatmul.mubr.msk.f32.gmra.mrb[2].mxu0 %vm402_vm13, %v399_v30  ;;  %772 = vmatmul.mubr.msk.f32.gmra.mrb[2].mxu1 %vm402_vm13, %v401_v31 }
  0x51   : > { %v604_v30 = vld [vmem:[#allocation3] sm:$0x3] }
  0x52   : > { %v609_v31 = vrot.slane %v604_v30, %v1141_v11 }
 0x11f   : > { %v488_v33 = vpop.f32.mrb[0].mxu0  ;;  %v500_v34 = vpop.f32.mrb[0].mxu1 }
 0x120   : > { %v490_v36 = vpop.f32.mrb[1].mxu0  ;;  %v502_v37 = vpop.f32.mrb[1].mxu1  ;;  %v511_v41 = vsub.f32 %v358_v32, %v488_v33  ;;  %v515_v48 = vsub.f32 %v362_v38, %v500_v34  ;;  %v613_v32 = vrot.slane %v604_v30, %v1139_v10 }
 0x121   : > { %v512_v45 = vsub.f32 %v359_v35, %v490_v36  ;;  %v516_v53 = vsub.f32 %v363_v42, %v502_v37  ;;  %v616_v37 = vsel %vm591_vm14, %v609_v31, 0.0 }
 0x122   : > { %v519_v56 = vand.u32 2147483647, %v511_v41  ;;  %v523_v60 = vand.u32 2147483647, %v515_v48  ;;  %v617_v20 = vsel %vm591_vm14, %v613_v32, 0.0 }
 0x123   : > { %v494_v46 = vpop.f32.mrb[2].mxu0  ;;  %v506_v47 = vpop.f32.mrb[2].mxu1  ;;  %v520_v58 = vand.u32 2147483647, %v512_v45  ;;  %v524_v63 = vand.u32 2147483647, %v516_v53 }
 0x124   : > { %v513_v49 = vsub.f32 %v360_v39, %v494_v46  ;;  %v496_v50 = vpop.f32.mrb[3].mxu0  ;;  %v517_v51 = vsub.f32 %v364_v40, %v506_v47  ;;  %v508_v52 = vpop.f32.mrb[3].mxu1  ;;  %v618_v39 = vadd.f32 %v617_v20, %v616_v37 }
 0x125   : > { %v514_v54 = vsub.f32 %v361_v43, %v496_v50  ;;  %v518_v55 = vsub.f32 %v365_v44, %v508_v52 }
 0x126   : > { %v521_v57 = vand.u32 2147483647, %v513_v49  ;;  %v525_v62 = vand.u32 2147483647, %v517_v51  ;;  %v331_v51 = vand.u32 127, %v311_v0 }
 0x127   : > { %v522_v59 = vand.u32 2147483647, %v514_v54  ;;  %v526_v2 = vand.u32 2147483647, %v518_v55 }
 0x128   : > { %v527_v61 = vadd.f32 %v521_v57, %v519_v56  ;;  %vm629_vm15 = vcmp.eq.s32.totalorder %v331_v51, 1 }
 0x129   : > { %v536_v1 = vadd.f32 %v522_v59, %v520_v58 }
 0x12a   : > { %v528_v3 = vadd.f32 %v527_v61, %v523_v60 }
 0x12b   : > { %v537_v5 = vadd.f32 %v536_v1, %v524_v63 }
 0x12c   : > { %v529_v6 = vadd.f32 %v528_v3, %v525_v62 }
 0x12d   : > { %v538_v7 = vadd.f32 %v537_v5, %v526_v2 }
 0x12e   : > { %v530_v8 = vrot.slane %v529_v6, 4 }
 0x12f   : > { %v539_v9 = vrot.slane %v538_v7, 4 }
 0x130   : > { %v531_v12 = vadd.f32 %v530_v8, %v529_v6 }
 0x131   : > { %v540_v14 = vadd.f32 %v539_v9, %v538_v7 }
 0x132   : > { %v532_v15 = vrot.slane %v531_v12, 2 }
 0x133   : > { %v541_v16 = vrot.slane %v540_v14, 2 }
 0x134   : > { %v533_v17 = vadd.f32 %v532_v15, %v531_v12 }
 0x135   : > { %v542_v18 = vadd.f32 %v541_v16, %v540_v14 }
 0x136   : > { %v534_v19 = vrot.slane %v533_v17, 1 }
 0x137   : > { %v543_v21 = vrot.slane %v542_v18, 1 }
 0x138   : > { %v535_v22 = vadd.f32 %v534_v19, %v533_v17 }
 0x139   : > { %v544_v23 = vadd.f32 %v543_v21, %v542_v18 }
 0x13b   : > { %v548_v24 = vcombine.low %v535_v22, %v544_v23 }
 0x13d   : > { %v555_v25 = vrot.slane %v548_v24, %v1146_v13 }
 0x13f   : > { %v562_v27 = vrot.slane %v555_v25, %v1146_v13 }
 0x141   : > { %v564_v28 = vsel %vm1152_vm8, %v562_v27, 0.0 }
 0x142   : > { %v565_v29 = vadd.f32 %v564_v28, %v545_v26 }
 0x144   : > { %570 = vst.msk [vmem:[#allocation2] sm:$0x3] %vm1130_vm0, %v565_v29  ;;  %vm628_vm0 = vcmp.eq.s32.totalorder %v331_v51, 0 }
 0x14b   : > { %v579_v33 = vld [vmem:[#allocation2] sm:$0x3] }
 0x14c   : > { %v584_v34 = vrot.slane %v579_v33, %v1141_v11  ;;  %v588_v35 = vrot.slane %v579_v33, %v1139_v10 }
 0x14e   : > { %v592_v36 = vsel %vm591_vm14, %v584_v34, 0.0  ;;  %v593_v13 = vsel %vm591_vm14, %v588_v35, 0.0 }
 0x14f   : > { %v594_v38 = vadd.f32 %v593_v13, %v592_v36 }
 0x151   : > { %595 = vadd.xlane.f32.xlu0 %v594_v38 }
 0x155   : > { %619 = vadd.xlane.f32.xlu0 %v618_v39 }
 0x1de   : > { %v596_v4 = vpop.xlane.xlu0 %595 }
 0x1df   : > { %v597_v40 = vrot.slane %v596_v4, 4 }
 0x1e1   : > { %v598_v41 = vadd.f32 %v597_v40, %v596_v4 }
 0x1e2   : > { %v620_v42 = vpop.xlane.xlu0 %619 }
 0x1e3   : > { %v599_v43 = vrot.slane %v598_v41, 2  ;;  %v621_v44 = vrot.slane %v620_v42, 4 }
 0x1e5   : > { %v622_v45 = vadd.f32 %v621_v44, %v620_v42  ;;  %v600_v11 = vadd.f32 %v599_v43, %v598_v41 }
 0x1e7   : > { %v623_v46 = vrot.slane %v622_v45, 2  ;;  %v601_v10 = vrot.slane %v600_v11, 1 }
 0x1e9   : > { %v624_v47 = vadd.f32 %v623_v46, %v622_v45  ;;  %v602_v48 = vadd.f32 %v601_v10, %v600_v11 }
 0x1eb   : > { %786 = vpush %v602_v48  ;;  %v625_v49 = vrot.slane %v624_v47, 1 }
 0x1ed   : > { %v626_v50 = vadd.f32 %v625_v49, %v624_v47 }
 0x1ef   : > { %788 = vpush %v626_v50 }
 0x21c   : > { %s787_s21 = spop %786 }
 0x21d   : > { %v632_v53 = vstv %s787_s21 }
 0x220   : > { %s789_s26 = spop %788 }
 0x221   : > { %v630_v52 = vstv %s789_s26 }
 0x222   : > { %v631_v54 = vsel %vm629_vm15, %v630_v52, 0.0 }
 0x223   : > { %v633_v0 = vsel %vm628_vm0, %v632_v53, %v631_v54 }
 0x224   : > { %634 = vst [vmem:[%s287_s23] sm:$0x1] %v633_v0 }
 0x225   : > { %901 = shalt.err (!%p898_p4)
}
 0x226   : > { %s902_s14 = scalar_lea.hbm %s1200_s13, 16  ;;  %s906_s8 = scalar_lea.hbm %s1253_s4, 32 }
 0x227   : > { %p903_p7 = scmp.ne.s32.totalorder %s1200_s13, %s902_s14  ;;  %p907_p1 = scmp.lt.u32.totalorder %s1200_s13, %s1253_s4 }
 0x228   : > { %p908_p3 = scmp.lt.u32.totalorder %s906_s8, %s902_s14  ;;  %p910_p8 = scmp.lt.u32.totalorder %s902_s14, %s1200_s13 }
 0x229   : > { %p904_p10 = pnand %p903_p7, %p1265_p11 }
 0x22a   : > { %p909_p9 = por %p908_p3, %p907_p1 }
 0x22b   : > { %p905_p12 = pneg %p904_p10 }
 0x22c   : > { %p911_p0 = por %p910_p8, %p909_p9 }
 0x22e   : > { %p912_p6 = pnand %p911_p0, %p905_p12 }
 0x230   : > { %915 = shalt.err (!%p912_p6)
}
 0x231   : > { %792 = dma.vmem_to_hbm [thread:$0]  (%p1265_p11), %s1202_s9, 16, %s1200_s13, %s636_s1  }
 0x232 PF: > { %s662_s21 = sand.u32 1, %s950_s15   ;;  %p1266_p13 = scmp.ne.s32.totalorder %s1258_s29, 0 }
 0x233   : > { %p1267_p2 = scmp.ge.s32.totalorder %s970_s19, 2  ;;  %s663_s23 = scalar_lea.sflag [#allocation7], %s662_s21 }
 0x235   : > { %p799_p5 = pnand %p1267_p2, %p1266_p13 }
 0x237   : > { %945 = dma.done.wait (!%p799_p5), %s663_s23, 16  }
 0x238   : > { %947 = vsyncadd (!%p799_p5), %s663_s23, 4294967280  ;;  %s20_s19 = sadd.s32 1, %s970_s19   ;;  %s1268_s15 = smov %s954_s16 }
 0x239   : > { %p17_p4 = scmp.ge.s32.totalorder %s20_s19, 4   ;;  %s1269_s16 = smov %s958_s17 }
 0x23a   : > { %s1270_s17 = smov %s1061_s28  ;;  %s1271_s1 = smov %s966_s18 }
 0x23b   : > { %s1272_s18 = smov %s1274_s22  ;;  %19 = sbr.rel (!%p17_p4) target bundleno = 6 (0x6), region = 92 }
 0x242   :  { %667 = vsyncpa [#allocation6], 1 }
 0x243   :  { %669 = vsyncpa [#allocation6 + $0x1], 1 }
 0x244   :  { %670 = vsyncpa [#allocation7], 1 }
 0x245   :  { %672 = vsyncpa [#allocation7 + $0x1], 1 }

</bundles_post_ra>
